<compile_context>
chip_gen: v7x
topology: tpu7x:2x2x1
jax: 0.10.0
libtpu: 0.0.40
codegen_flags: <defaults>
</compile_context>

<pallas_src>
import functools

import jax
import jax.numpy as jnp
from jax.experimental import pallas as pl
from jax.experimental.pallas import tpu as pltpu

_MIB = 1024 * 1024


@functools.lru_cache(maxsize=1)
def _vmem_budget_bytes():
    """Scoped-VMEM budget: ~85% of physical VMEM, capped; 48 MiB fallback."""
    try:
        info = pltpu.get_tpu_info()
        cap = int(getattr(info, "vmem_capacity_bytes", 0) or 0)
        if cap > 0:
            return int(min(112 * _MIB, 0.85 * cap))
    except Exception:
        pass
    return 48 * _MIB


# -----------------------------------------------------------------------------
# Shared per-layer compute: h = LeakyReLU((A @ X) @ (diag(r) @ W))
# -----------------------------------------------------------------------------
def _layer_step(adj, x, w, compute_dtype):
    agg = jnp.dot(adj, x, preferred_element_type=jnp.float32)
    # Second matmul in compute dtype (perf review): cast the small agg
    # activation; keep f32 MXU accumulation.
    h = jnp.dot(agg.astype(compute_dtype), w, preferred_element_type=jnp.float32)
    # LeakyReLU, negative_slope = 0.01 (PyTorch default)
    return jnp.where(h > 0.0, h, 0.01 * h)


# -----------------------------------------------------------------------------
# Resident-adjacency kernel: grid = (R, n_layers), adjacency fetched once per
# relation and kept in VMEM across all layers.
# -----------------------------------------------------------------------------
def _resident_kernel(adj_ref, ego_ref, w_ref, out_ref, x_ref, *, compute_dtype):
    # adj_ref : (1, N, N)  adjacency (compute dtype), resident across layers
    # ego_ref : (N, D) f32 shared layer-0 embeddings (resident across grid)
    # w_ref   : (1, D, D)  diag(r_i^k) @ W_gc_k (compute dtype)
    # out_ref : (1, N, D)  f32 accumulator ego + sum_k h^k (resident across k)
    # x_ref   : (N, D)     VMEM scratch carrying the per-relation embedding
    k = pl.program_id(1)

    @pl.when(k == 0)
    def _init():
        ego = ego_ref[...]
        x_ref[...] = ego.astype(x_ref.dtype)
        out_ref[0] = ego

    h = _layer_step(adj_ref[0], x_ref[...], w_ref[0], compute_dtype)
    out_ref[0] = out_ref[0] + h                 # running sum stays f32
    x_ref[...] = h.astype(x_ref.dtype)          # carry to next layer
    # TODO(synk): nn.Dropout(mess_dropout) skipped — eval-mode identity.


def _resident_kernel_q(adj_ref, scale_ref, ego_ref, w_ref, out_ref,
                       adj_vmem, x_ref, *, compute_dtype):
    # int8 adjacency stream: halves adjacency HBM bytes.  Dequantized ONCE per
    # relation (k == 0) into a VMEM scratch; all layers reuse that copy.
    # adj_ref   : (1, N, N) int8
    # scale_ref : (1, N, 1) f32 per-row dequant scale
    # adj_vmem  : (N, N) compute-dtype dequantized adjacency scratch
    k = pl.program_id(1)

    @pl.when(k == 0)
    def _init():
        deq = adj_ref[0].astype(jnp.float32) * scale_ref[0]
        adj_vmem[...] = deq.astype(adj_vmem.dtype)
        ego = ego_ref[...]
        x_ref[...] = ego.astype(x_ref.dtype)
        out_ref[0] = ego

    h = _layer_step(adj_vmem[...], x_ref[...], w_ref[0], compute_dtype)
    out_ref[0] = out_ref[0] + h
    x_ref[...] = h.astype(x_ref.dtype)


# -----------------------------------------------------------------------------
# Row-tiled fallback kernel for N past the resident-adjacency VMEM cap.
# grid = (R, L, N // TM): the layer axis sits OUTSIDE the row-tile axis, the
# adjacency row-tile is re-streamed once per layer, the full (N, D) carry is
# ping-ponged between two VMEM buffers (layer k reads the complete previous
# layer while writing only its own row tile), and the running sum lives in an
# f32 VMEM accumulator so revisited output blocks never need a read-back.
# -----------------------------------------------------------------------------
def _tiled_kernel(adj_ref, ego_ref, w_ref, out_ref, x_a, x_b, acc_ref,
                  *, tm, compute_dtype):
    k = pl.program_id(1)
    m = pl.program_id(2)
    rows = pl.ds(pl.multiple_of(m * tm, tm), tm)

    @pl.when(jnp.logical_and(k == 0, m == 0))
    def _init_carry():
        x_a[...] = ego_ref[...].astype(x_a.dtype)

    def step(src_ref, dst_ref):
        h = _layer_step(adj_ref[0], src_ref[...], w_ref[0], compute_dtype)

        @pl.when(k == 0)
        def _():
            acc_ref[rows, :] = ego_ref[rows, :] + h

        @pl.when(k > 0)
        def _():
            acc_ref[rows, :] = acc_ref[rows, :] + h

        dst_ref[rows, :] = h.astype(dst_ref.dtype)
        out_ref[0] = acc_ref[rows, :]   # fully (re)written every visit

    @pl.when(k % 2 == 0)
    def _even():
        step(x_a, x_b)

    @pl.when(k % 2 == 1)
    def _odd():
        step(x_b, x_a)


# -----------------------------------------------------------------------------
# Dispatcher: resident (preferred) vs row-tiled fallback.
# -----------------------------------------------------------------------------
def fused_gcn(adj_stream, adj_scale, ego, w_scaled, n_layers, *,
              compute_dtype, force_tiled=False, row_tile=None):
    """adj_stream:[R,N,N], ego:[N,D] f32, w_scaled:[L*R,D,D] -> [R,N,D] f32."""
    R, N, _ = adj_stream.shape
    D = ego.shape[1]
    L = n_layers
    budget = _vmem_budget_bytes()
    cbytes = jnp.dtype(compute_dtype).itemsize
    sbytes = jnp.dtype(adj_stream.dtype).itemsize
    quantized = adj_stream.dtype == jnp.dtype(jnp.int8)

    # Resident-path VMEM estimate: double-buffered adjacency + residents.
    resident_need = (2 * N * N * sbytes                    # adj (2 buffers)
                     + (N * N * cbytes if quantized else 0)  # dequant scratch
                     + N * D * 4                            # ego (f32)
                     + 2 * N * D * 4                        # out (f32, 2 bufs)
                     + N * D * cbytes                       # carry
                     + 4 * D * D * cbytes                   # w (2 bufs)
                     + 2 * _MIB)                            # headroom
    use_resident = (not force_tiled) and resident_need <= budget

    params = pltpu.CompilerParams(
        dimension_semantics=(("parallel", "arbitrary") if use_resident
                             else ("parallel", "arbitrary", "arbitrary")),
        vmem_limit_bytes=int(budget),
    )

    if use_resident:
        if quantized:
            kernel = functools.partial(_resident_kernel_q,
                                       compute_dtype=compute_dtype)
            in_specs = [
                pl.BlockSpec((1, N, N), lambda i, k: (i, 0, 0)),
                pl.BlockSpec((1, N, 1), lambda i, k: (i, 0, 0)),
                pl.BlockSpec((N, D), lambda i, k: (0, 0)),
                pl.BlockSpec((1, D, D), lambda i, k: (k * R + i, 0, 0)),
            ]
            scratch = [pltpu.VMEM((N, N), compute_dtype),
                       pltpu.VMEM((N, D), compute_dtype)]
            args = (adj_stream, adj_scale, ego, w_scaled)
        else:
            kernel = functools.partial(_resident_kernel,
                                       compute_dtype=compute_dtype)
            in_specs = [
                pl.BlockSpec((1, N, N), lambda i, k: (i, 0, 0)),
                pl.BlockSpec((N, D), lambda i, k: (0, 0)),
                pl.BlockSpec((1, D, D), lambda i, k: (k * R + i, 0, 0)),
            ]
            scratch = [pltpu.VMEM((N, D), compute_dtype)]
            args = (adj_stream, ego, w_scaled)

        return pl.pallas_call(
            kernel,
            out_shape=jax.ShapeDtypeStruct((R, N, D), jnp.float32),
            grid=(R, L),
            in_specs=in_specs,
            out_specs=pl.BlockSpec((1, N, D), lambda i, k: (i, 0, 0)),
            scratch_shapes=scratch,
            compiler_params=params,
        )(*args)

    # ---------------- Row-tiled fallback (large N) ----------------
    if quantized:
        # TODO(synk): per-row-tile dequant for the tiled path; for now fall
        # back to a one-time dequantized compute-dtype copy of the adjacency.
        adj_stream = (adj_stream.astype(jnp.float32) * adj_scale).astype(compute_dtype)
        sbytes = cbytes

    if row_tile is None:
        row_tile = N
        for t in (1024, 512, 256, 128, 64, 32, 16, 8):
            if t <= N and N % t == 0:
                need = (2 * t * N * sbytes + 2 * t * D * 4
                        + N * D * (4 + 2 * cbytes) + N * D * 4
                        + 4 * D * D * cbytes + 2 * _MIB)
                if need <= budget:
                    row_tile = t
                    break
    assert N % row_tile == 0, "row_tile must divide num_nodes"
    m_tiles = N // row_tile

    kernel = functools.partial(_tiled_kernel, tm=row_tile,
                               compute_dtype=compute_dtype)
    return pl.pallas_call(
        kernel,
        out_shape=jax.ShapeDtypeStruct((R, N, D), jnp.float32),
        grid=(R, L, m_tiles),
        in_specs=[
            pl.BlockSpec((1, row_tile, N), lambda i, k, m: (i, m, 0)),
            pl.BlockSpec((N, D), lambda i, k, m: (0, 0)),
            pl.BlockSpec((1, D, D), lambda i, k, m: (k * R + i, 0, 0)),
        ],
        out_specs=pl.BlockSpec((1, row_tile, D), lambda i, k, m: (i, m, 0)),
        scratch_shapes=[pltpu.VMEM((N, D), compute_dtype),
                        pltpu.VMEM((N, D), compute_dtype),
                        pltpu.VMEM((N, D), jnp.float32)],
        compiler_params=params,
    )(adj_stream, ego, w_scaled)


# -----------------------------------------------------------------------------
# One-time (model-setup) adjacency preparation — hoisted off the hot path.
# -----------------------------------------------------------------------------
def prepare_adjacency(adjs, adj_dtype):
    """Convert the constant pre_adjs once.  Returns (adj_stream, scale|None)."""
    adj_dtype = jnp.dtype(adj_dtype)
    if adj_dtype == jnp.dtype(jnp.int8):
        amax = jnp.max(jnp.abs(adjs), axis=-1, keepdims=True)
        scale = jnp.maximum(amax, 1e-30) / 127.0
        q = jnp.clip(jnp.round(adjs / scale), -127, 127).astype(jnp.int8)
        return q, scale.astype(jnp.float32)
    return adjs.astype(adj_dtype), None


# -----------------------------------------------------------------------------
# Full MBSSL forward (tiny glue in plain JAX, hot path in the fused kernel).
# -----------------------------------------------------------------------------
@functools.partial(jax.jit, static_argnames=("n_users", "compute_dtype",
                                             "force_tiled", "row_tile"))
def mbssl_forward(adj_stream, adj_scale, user_emb, item_emb, rel_emb,
                  w_gc_stack, w_rel_stack, *, n_users,
                  compute_dtype=jnp.bfloat16, force_tiled=False, row_tile=None):
    R, N, _ = adj_stream.shape
    D = user_emb.shape[1]
    L = w_gc_stack.shape[0]

    ego = jnp.concatenate([user_emb, item_emb], axis=0)               # [N, D] f32

    # Relation-embedding updates: tiny batched [R,D]@[D,D] matmuls done once in
    # the wrapper (degenerate M=1 MXU matmuls are kept out of the kernel).
    rela_list = [rel_emb]
    for k in range(L):
        rela_list.append(rela_list[k] @ w_rel_stack[k])

    # Fold the relation scaling into the layer weight:
    #   (A@X * r) @ W == (A@X) @ (diag(r) @ W);  cast to compute dtype so the
    # in-kernel second matmul runs on the fast MXU path (perf review).
    rela_used = jnp.stack(rela_list[:L], axis=0)                      # [L, R, D]
    w_scaled = rela_used[:, :, :, None] * w_gc_stack[:, None, :, :]   # [L, R, D, D]
    w_scaled = w_scaled.reshape(L * R, D, D).astype(compute_dtype)

    summed = fused_gcn(adj_stream, adj_scale, ego, w_scaled, L,
                       compute_dtype=compute_dtype,
                       force_tiled=force_tiled, row_tile=row_tile)    # [R, N, D]

    # Single transpose to node-major after the layer loop.
    all_emb = jnp.transpose(summed, (1, 0, 2)) / (L + 1)              # [N, R, D]

    u_g = all_emb[:n_users]                                           # [n_users, R, D]
    token = jnp.zeros((1, R, D), all_emb.dtype)
    i_g = jnp.concatenate([all_emb[n_users:], token], axis=0)         # [n_items+1, R, D]
    rela_mean = jnp.mean(jnp.stack(rela_list, axis=0), axis=0)[:, None, :]  # [R,1,D]
    return u_g, i_g, rela_mean


# -----------------------------------------------------------------------------
# Pure-JAX reference (mirrors the PyTorch forward) for verification.
# -----------------------------------------------------------------------------
def mbssl_reference(adjs, user_emb, item_emb, rel_emb, w_gc_stack, w_rel_stack,
                    n_users):
    R, N, _ = adjs.shape
    D = user_emb.shape[1]
    L = w_gc_stack.shape[0]
    ego = jnp.concatenate([user_emb, item_emb], axis=0)
    ego_nrd = jnp.broadcast_to(ego[:, None, :], (N, R, D))
    all_emb = ego_nrd
    rela = [[rel_emb[i:i + 1]] for i in range(R)]
    for k in range(L):
        outs = []
        for i in range(R):
            agg = adjs[i] @ ego_nrd[:, i, :]
            h = (agg * rela[i][k]) @ w_gc_stack[k]
            h = jnp.where(h > 0, h, 0.01 * h)
            outs.append(h)
        for i in range(R):
            rela[i].append(rela[i][k] @ w_rel_stack[k])
        ego_nrd = jnp.stack(outs, axis=1)
        all_emb = all_emb + ego_nrd
    all_emb = all_emb / (L + 1)
    u_g = all_emb[:n_users]
    i_g = jnp.concatenate([all_emb[n_users:],
                           jnp.zeros((1, R, D), all_emb.dtype)], axis=0)
    rela_mean = jnp.stack(
        [jnp.mean(jnp.stack(rela[i], 0), 0) for i in range(R)], axis=0)
    return u_g, i_g, rela_mean


def xavier_uniform(key, shape):
    fan_in, fan_out = shape[-2], shape[-1]
    a = (6.0 / (fan_in + fan_out)) ** 0.5
    return jax.random.uniform(key, shape, jnp.float32, minval=-a, maxval=a)


if __name__ == "__main__":
    # Small synthetic configuration consistent with MBSSL.__init__ / forward.
    n_users, n_items = 24, 40
    N = n_users + n_items            # 64 nodes
    D = 32                           # emb_dim
    R = 3                            # n_relations (behaviors)
    n_layers = 2                     # layer_size = [32, 32]

    key = jax.random.PRNGKey(0)
    ks = jax.random.split(key, 7)

    user_emb = xavier_uniform(ks[0], (n_users, D))
    item_emb = xavier_uniform(ks[1], (n_items, D))
    rel_emb = xavier_uniform(ks[2], (R, D))
    w_gc = jnp.stack([xavier_uniform(k, (D, D))
                      for k in jax.random.split(ks[3], n_layers)])
    w_rel = jnp.stack([xavier_uniform(k, (D, D))
                       for k in jax.random.split(ks[4], n_layers)])

    # Dense, row-normalized "adjacency" per relation (stands in for the sparse
    # pre_adjs; torch.sparse.mm is densified for this synthetic kernel).
    raw = jax.random.uniform(ks[5], (R, N, N), jnp.float32)
    mask = (jax.random.uniform(ks[6], (R, N, N)) < 0.2).astype(jnp.float32)
    adjs = raw * mask
    adjs = adjs / (jnp.sum(adjs, axis=-1, keepdims=True) + 1e-6)

    u_ref, i_ref, r_ref = mbssl_reference(
        adjs, user_emb, item_emb, rel_emb, w_gc, w_rel, n_users)

    # --- 1) f32 resident path: tight check against the reference. ---
    adj_f32, _ = prepare_adjacency(adjs, jnp.float32)      # one-time setup cost
    u_g, i_g, rela_mean = mbssl_forward(
        adj_f32, None, user_emb, item_emb, rel_emb, w_gc, w_rel,
        n_users=n_users, compute_dtype=jnp.float32)
    jax.block_until_ready((u_g, i_g, rela_mean))
    assert u_g.shape == (n_users, R, D)
    assert i_g.shape == (n_items + 1, R, D)
    assert rela_mean.shape == (R, 1, D)
    assert jnp.allclose(u_g, u_ref, atol=5e-3, rtol=5e-3)
    assert jnp.allclose(i_g, i_ref, atol=5e-3, rtol=5e-3)
    assert jnp.allclose(rela_mean, r_ref, atol=5e-3, rtol=5e-3)

    # --- 2) bf16 streaming path (default): adjacency cast hoisted to setup. ---
    adj_bf16, _ = prepare_adjacency(adjs, jnp.bfloat16)
    u_b, i_b, r_b = mbssl_forward(
        adj_bf16, None, user_emb, item_emb, rel_emb, w_gc, w_rel,
        n_users=n_users, compute_dtype=jnp.bfloat16)
    jax.block_until_ready((u_b, i_b, r_b))
    assert jnp.allclose(u_b, u_ref, atol=2e-2, rtol=2e-2)
    assert jnp.allclose(i_b, i_ref, atol=2e-2, rtol=2e-2)
    assert jnp.allclose(r_b, r_ref, atol=2e-2, rtol=2e-2)

    # --- 3) int8 adjacency stream (dequant once per relation in VMEM). ---
    adj_i8, adj_sc = prepare_adjacency(adjs, jnp.int8)
    u_q, i_q, r_q = mbssl_forward(
        adj_i8, adj_sc, user_emb, item_emb, rel_emb, w_gc, w_rel,
        n_users=n_users, compute_dtype=jnp.bfloat16)
    jax.block_until_ready((u_q, i_q, r_q))
    assert jnp.allclose(u_q, u_ref, atol=3e-2, rtol=3e-2)
    assert jnp.allclose(i_q, i_ref, atol=3e-2, rtol=3e-2)
    assert jnp.allclose(r_q, r_ref, atol=3e-2, rtol=3e-2)

    # --- 4) row-tiled fallback (forced, f32): the large-N path. ---
    u_t, i_t, r_t = mbssl_forward(
        adj_f32, None, user_emb, item_emb, rel_emb, w_gc, w_rel,
        n_users=n_users, compute_dtype=jnp.float32,
        force_tiled=True, row_tile=32)
    jax.block_until_ready((u_t, i_t, r_t))
    assert jnp.allclose(u_t, u_ref, atol=5e-3, rtol=5e-3)
    assert jnp.allclose(i_t, i_ref, atol=5e-3, rtol=5e-3)
    assert jnp.allclose(r_t, r_ref, atol=5e-3, rtol=5e-3)

    print("KERNEL_OK")
</pallas_src>

<mosaic_0001>
module attributes {stable_mosaic.version = 11 : i64} {
  func.func @_resident_kernel(%arg0: i32, %arg1: i32, %arg2: memref<1x64x64xf32, #tpu.memory_space<vmem>>, %arg3: memref<64x32xf32, #tpu.memory_space<vmem>>, %arg4: memref<1x32x32xf32, #tpu.memory_space<vmem>>, %arg5: memref<1x64x32xf32, #tpu.memory_space<vmem>>, %arg6: memref<64x32xf32, #tpu.memory_space<vmem>>) attributes {dimension_semantics = [#tpu.dimension_semantics<parallel>, #tpu.dimension_semantics<arbitrary>], iteration_bounds = array<i64: 3, 2>, scalar_prefetch = 0 : i64, scratch_operands = 1 : i64, tpu.core_type = #tpu.core_type<tc>, window_params = [{transform_indices = @transform_0, window_bounds = array<i64: 1, 64, 64>}, {pipeline_mode = #tpu.pipeline_mode<synchronous>, transform_indices = @transform_1, window_bounds = array<i64: 64, 32>}, {transform_indices = @transform_2, window_bounds = array<i64: 1, 32, 32>}, {transform_indices = @transform_3, window_bounds = array<i64: 1, 64, 32>}]} {
    %c0_i32 = arith.constant 0 : i32
    %0 = arith.cmpi eq, %arg1, %c0_i32 : i32
    %1 = arith.extui %0 : i1 to i32
    %c0_i32_0 = arith.constant 0 : i32
    %2 = arith.cmpi ne, %1, %c0_i32_0 : i32
    scf.if %2 {
      %c0_19 = arith.constant 0 : index
      %c0_20 = arith.constant 0 : index
      %22 = vector.load %arg3[%c0_19, %c0_20] : memref<64x32xf32, #tpu.memory_space<vmem>>, vector<64x32xf32>
      %c0_21 = arith.constant 0 : index
      %c0_22 = arith.constant 0 : index
      %23 = vector.load %arg6[%c0_21, %c0_22] : memref<64x32xf32, #tpu.memory_space<vmem>>, vector<64x32xf32>
      tpu.vector_store %arg6[%c0_21, %c0_22], %22 {strides = array<i32>} : memref<64x32xf32, #tpu.memory_space<vmem>>, vector<64x32xf32>,
      %c0_23 = arith.constant 0 : index
      %c0_24 = arith.constant 0 : index
      %c0_25 = arith.constant 0 : index
      %24 = vector.load %arg5[%c0_23, %c0_24, %c0_25] : memref<1x64x32xf32, #tpu.memory_space<vmem>>, vector<1x64x32xf32>
      %25 = vector.shape_cast %24 : vector<1x64x32xf32> to vector<64x32xf32>
      %26 = vector.shape_cast %22 : vector<64x32xf32> to vector<1x64x32xf32>
      tpu.vector_store %arg5[%c0_23, %c0_24, %c0_25], %26 {strides = array<i32>} : memref<1x64x32xf32, #tpu.memory_space<vmem>>, vector<1x64x32xf32>,
    } else {
    }
    %c0 = arith.constant 0 : index
    %c0_1 = arith.constant 0 : index
    %c0_2 = arith.constant 0 : index
    %3 = vector.load %arg2[%c0, %c0_1, %c0_2] : memref<1x64x64xf32, #tpu.memory_space<vmem>>, vector<1x64x64xf32>
    %4 = vector.shape_cast %3 : vector<1x64x64xf32> to vector<64x64xf32>
    %c0_3 = arith.constant 0 : index
    %c0_4 = arith.constant 0 : index
    %5 = vector.load %arg6[%c0_3, %c0_4] : memref<64x32xf32, #tpu.memory_space<vmem>>, vector<64x32xf32>
    %c0_5 = arith.constant 0 : index
    %c0_6 = arith.constant 0 : index
    %c0_7 = arith.constant 0 : index
    %6 = vector.load %arg4[%c0_5, %c0_6, %c0_7] : memref<1x32x32xf32, #tpu.memory_space<vmem>>, vector<1x32x32xf32>
    %7 = vector.shape_cast %6 : vector<1x32x32xf32> to vector<32x32xf32>
    %cst = arith.constant dense<0.000000e+00> : vector<64x32xf32>
    %8 = tpu.matmul %4, %5, %cst {dimension_numbers = #tpu.dot_dimension_numbers<[1], [0], [0], [1], [0, 0, 1, 1], [], []>} : vector<64x64xf32>, vector<64x32xf32>, vector<64x32xf32> -> vector<64x32xf32>
    %cst_8 = arith.constant dense<0.000000e+00> : vector<64x32xf32>
    %9 = tpu.matmul %8, %7, %cst_8 {dimension_numbers = #tpu.dot_dimension_numbers<[1], [0], [0], [1], [0, 0, 1, 1], [], []>} : vector<64x32xf32>, vector<32x32xf32>, vector<64x32xf32> -> vector<64x32xf32>
    %cst_9 = arith.constant 0.000000e+00 : f32
    %10 = vector.broadcast %cst_9 : f32 to vector<64x32xf32>
    %11 = arith.cmpf ogt, %9, %10 : vector<64x32xf32>
    %cst_10 = arith.constant 0.00999999977 : f32
    %12 = vector.broadcast %cst_10 : f32 to vector<64x32xf32>
    %13 = arith.mulf %12, %9 : vector<64x32xf32>
    %14 = arith.select %11, %9, %13 : vector<64x32xi1>, vector<64x32xf32>
    %c0_11 = arith.constant 0 : index
    %c0_12 = arith.constant 0 : index
    %c0_13 = arith.constant 0 : index
    %15 = vector.load %arg5[%c0_11, %c0_12, %c0_13] : memref<1x64x32xf32, #tpu.memory_space<vmem>>, vector<1x64x32xf32>
    %16 = vector.shape_cast %15 : vector<1x64x32xf32> to vector<64x32xf32>
    %17 = arith.addf %16, %14 : vector<64x32xf32>
    %c0_14 = arith.constant 0 : index
    %c0_15 = arith.constant 0 : index
    %c0_16 = arith.constant 0 : index
    %18 = vector.load %arg5[%c0_14, %c0_15, %c0_16] : memref<1x64x32xf32, #tpu.memory_space<vmem>>, vector<1x64x32xf32>
    %19 = vector.shape_cast %18 : vector<1x64x32xf32> to vector<64x32xf32>
    %20 = vector.shape_cast %17 : vector<64x32xf32> to vector<1x64x32xf32>
    tpu.vector_store %arg5[%c0_14, %c0_15, %c0_16], %20 {strides = array<i32>} : memref<1x64x32xf32, #tpu.memory_space<vmem>>, vector<1x64x32xf32>,
    %c0_17 = arith.constant 0 : index
    %c0_18 = arith.constant 0 : index
    %21 = vector.load %arg6[%c0_17, %c0_18] : memref<64x32xf32, #tpu.memory_space<vmem>>, vector<64x32xf32>
    tpu.vector_store %arg6[%c0_17, %c0_18], %14 {strides = array<i32>} : memref<64x32xf32, #tpu.memory_space<vmem>>, vector<64x32xf32>,
    return
  }
  func.func @transform_0(%arg0: i32, %arg1: i32) -> (i32, i32, i32) {
    %c0_i32 = arith.constant 0 : i32
    %c0_i32_0 = arith.constant 0 : i32
    %c0_i32_1 = arith.constant 0 : i32
    return %arg0, %c0_i32, %c0_i32_0 : i32, i32, i32
  }
  func.func @transform_1(%arg0: i32, %arg1: i32) -> (i32, i32) {
    %c0_i32 = arith.constant 0 : i32
    %c0_i32_0 = arith.constant 0 : i32
    %c0_i32_1 = arith.constant 0 : i32
    return %c0_i32, %c0_i32_0 : i32, i32
  }
  func.func @transform_2(%arg0: i32, %arg1: i32) -> (i32, i32, i32) {
    %c3_i32 = arith.constant 3 : i32
    %0 = arith.muli %arg1, %c3_i32 : i32
    %1 = arith.addi %0, %arg0 : i32
    %c0_i32 = arith.constant 0 : i32
    %c0_i32_0 = arith.constant 0 : i32
    %c0_i32_1 = arith.constant 0 : i32
    return %1, %c0_i32, %c0_i32_0 : i32, i32, i32
  }
  func.func @transform_3(%arg0: i32, %arg1: i32) -> (i32, i32, i32) {
    %c0_i32 = arith.constant 0 : i32
    %c0_i32_0 = arith.constant 0 : i32
    %c0_i32_1 = arith.constant 0 : i32
    return %arg0, %c0_i32, %c0_i32_0 : i32, i32, i32
  }
}

</mosaic_0001>

<bundles_post_ra>
// kernel: mbssl_forward.1
= control target key start
LH: loop header
LB: loop body
LE: loop exit
PB: predicated region body
PF: predicated region fallthrough
CT: control target
= control target key end

     0   :  { %s893_s12 = smov 0   ;;  %s895_s13 = smov 0   ;;  %s1061_s0 = inlined_call_operand.vmem [shape: f32[3,64,64], index: 0, kind: input, shape index: {}]   ;;  %s1062_s1 = inlined_call_operand.vmem [shape: f32[64,32], index: 1, kind: input, shape index: {}]   ;;  %s1063_s2 = inlined_call_operand.vmem [shape: f32[6,32,32], index: 2, kind: input, shape index: {}]   ;;  %s1064_s3 = inlined_call_operand.vmem [shape: f32[3,64,32], index: 3, kind: output, shape index: {}]  }
   0x1   :  { %s897_s14 = smov 0   ;;  %s899_s15 = smov 0  }
   0x2   :  { %s901_s16 = smov 0  }
   0x3 LB: > { %s22_s17 = sadd.s32 1, %s863_s14  ;;  %s25_s18 = sadd.s32 1, %s867_s15  ;;  %s871_s16 = sphi %s901_s16, %s13_s16   ;;  %s867_s15 = sphi %s899_s15, %s1068_s15   ;;  %s863_s14 = sphi %s897_s14, %s1067_s14   ;;  %s859_s13 = sphi %s895_s13, %s1066_s13   ;;  %s855_s12 = sphi %s893_s12, %s1065_s12  }
   0x4   : > { %p23_p0 = scmp.ge.s32.totalorder %s22_s17, 2  ;;  %p664_p1 = scmp.ge.s32.totalorder %s871_s16, 1 }
   0x5   : > { %p167_p2 = scmp.lt.s32.totalorder %s871_s16, 7 }
   0x6   : > { %s1070_s17 = smov (%p23_p0, %s22_s17), 0  ;;  %s1072_s18 = smov (!%p23_p0, %s25_s18), %s867_s15 }
   0x7   : > { %p168_p3 = pnand %p664_p1, %p167_p2  ;;  %p27_p4 = scmp.ge.s32.totalorder %s1072_s18, 3 }
   0x8   : > { %p198_p5 = scmp.lt.s32.totalorder (!%p168_p3), %s859_s13, 2  ;;  %s203_s19 = smul.u32 (!%p168_p3), 3, %s855_s12 }
   0x9   : > { %s1074_s18 = smov (%p27_p4, %s1072_s18), 0  ;;  %171 = sbr.rel (%p168_p3) target bundleno = 493 (0x1ed), region = 32 }
   0xa   : > { %s204_s21 = sadd.s32 (!%p168_p3), %s859_s13, %s203_s19  ;;  %p671_p7 = scmp.ne.s32.totalorder (!%p168_p3), %s855_s12, 0 }
   0xb   : > { %p205_p6 = scmp.lt.s32.totalorder (!%p168_p3), %s204_s21, 5 }
  0x10   : > { %s199_s20 = scalar_select %p198_p5, %s859_s13, 2 }
  0x11   : > { %s1076_s21 = smov (!%p205_p6, %s204_s21), 5  ;;  %220 = sbr.rel (%p671_p7) target bundleno = 27 (0x1b), region = 36 }
  0x12   : > { %s690_s22 = sshll.u32 %s199_s20, 6  ;;  %s691_s29 = sshll.u32 %s1076_s21, 5  ;;  %v221_v0 = vld [vmem:[%s1062_s1] sm:$0xff] (!%p671_p7)  ;;  %vm229_vm0 = vcmask (!%p671_p7), 261120   ;;  %v222_v1 = vld [vmem:[%s1062_s1 + $0x8] sm:$0xff] (!%p671_p7)  ;;  %v223_v2 = vld [vmem:[%s1062_s1 + $0x10] sm:$0xff] (!%p671_p7) }
  0x13   : > { %s926_s25 = scalar_lea.vmem %s1061_s0, %s690_s22  ;;  %s931_s28 = scalar_lea.vmem %s1064_s3, %s690_s22  ;;  %230 = vst.msk [vmem:[#allocation2] sm:$0xff] (!%p671_p7), %vm229_vm0, %v221_v0  ;;  %231 = vst.msk [vmem:[#allocation2 + $0x8] sm:$0xff] (!%p671_p7), %vm229_vm0, %v222_v1  ;;  %v224_v3 = vld [vmem:[%s1062_s1 + $0x18] sm:$0xff] (!%p671_p7)  ;;  %v225_v4 = vld [vmem:[%s1062_s1 + $0x20] sm:$0xff] (!%p671_p7) }
  0x14   : > { %s936_s5 = scalar_lea.vmem %s1063_s2, %s691_s29  ;;  %238 = vst.msk [vmem:[%s931_s28] sm:$0xff] (!%p671_p7), %vm229_vm0, %v221_v0  ;;  %239 = vst.msk [vmem:[%s931_s28 + $0x8] sm:$0xff] (!%p671_p7), %vm229_vm0, %v222_v1  ;;  %v226_v5 = vld [vmem:[%s1062_s1 + $0x28] sm:$0xff] (!%p671_p7)  ;;  %v227_v6 = vld [vmem:[%s1062_s1 + $0x30] sm:$0xff] (!%p671_p7) }
  0x15   : > { %232 = vst.msk [vmem:[#allocation2 + $0x10] sm:$0xff] (!%p671_p7), %vm229_vm0, %v223_v2  ;;  %240 = vst.msk [vmem:[%s931_s28 + $0x10] sm:$0xff] (!%p671_p7), %vm229_vm0, %v223_v2  ;;  %v228_v7 = vld [vmem:[%s1062_s1 + $0x38] sm:$0xff] (!%p671_p7) }
  0x16   : > { %233 = vst.msk [vmem:[#allocation2 + $0x18] sm:$0xff] (!%p671_p7), %vm229_vm0, %v224_v3  ;;  %241 = vst.msk [vmem:[%s931_s28 + $0x18] sm:$0xff] (!%p671_p7), %vm229_vm0, %v224_v3 }
  0x17   : > { %234 = vst.msk [vmem:[#allocation2 + $0x20] sm:$0xff] (!%p671_p7), %vm229_vm0, %v225_v4  ;;  %242 = vst.msk [vmem:[%s931_s28 + $0x20] sm:$0xff] (!%p671_p7), %vm229_vm0, %v225_v4 }
  0x18   : > { %235 = vst.msk [vmem:[#allocation2 + $0x28] sm:$0xff] %vm229_vm0, %v226_v5  ;;  %243 = vst.msk [vmem:[%s931_s28 + $0x28] sm:$0xff] %vm229_vm0, %v226_v5 }
  0x19   : > { %236 = vst.msk [vmem:[#allocation2 + $0x30] sm:$0xff] %vm229_vm0, %v227_v6  ;;  %244 = vst.msk [vmem:[%s931_s28 + $0x30] sm:$0xff] %vm229_vm0, %v227_v6 }
  0x1a   : > { %237 = vst.msk [vmem:[#allocation2 + $0x38] sm:$0xff] %vm229_vm0, %v228_v7  ;;  %245 = vst.msk [vmem:[%s931_s28 + $0x38] sm:$0xff] %vm229_vm0, %v228_v7 }
  0x1b PF: > { %vm266_vm1 = vcmask 523264   ;;  %v246_v16 = vld [vmem:[%s926_s25] sm:$0xff]  ;;  %v263_v20 = vld [vmem:[%s936_s5 + $0x8] sm:$0xff]  ;;  %v264_v23 = vld [vmem:[%s936_s5 + $0x10] sm:$0xff]  ;;  %vm396_vm2 = vcmask 261120  }
  0x1c   : > { %737 = vmatprep.mubr.msk.f32.mxu0 %vm266_vm1, %v246_v16  ;;  %v262_v19 = vld [vmem:[%s936_s5] sm:$0xff]  ;;  %v265_v24 = vld [vmem:[%s936_s5 + $0x18] sm:$0xff]  ;;  %v247_v27 = vld [vmem:[%s926_s25 + $0x8] sm:$0xff] }
  0x1d   : > { %v254_v8 = vld [vmem:[#allocation2] sm:$0xff]  ;;  %v255_v9 = vld [vmem:[#allocation2 + $0x8] sm:$0xff]  ;;  %v785_v22 = vpack.c.bf16 %v263_v20, %v262_v19  ;;  %v789_v25 = vpack.c.bf16 %v265_v24, %v264_v23  ;;  %v248_v28 = vld [vmem:[%s926_s25 + $0x10] sm:$0xff] }
  0x1e   : > { %v769_v11 = vpack.c.bf16 %v255_v9, %v254_v8  ;;  %v249_v29 = vld [vmem:[%s926_s25 + $0x18] sm:$0xff]  ;;  %v250_v30 = vld [vmem:[%s926_s25 + $0x20] sm:$0xff]  ;;  %v251_v31 = vld [vmem:[%s926_s25 + $0x28] sm:$0xff] }
  0x1f   : > { %v256_v10 = vld [vmem:[#allocation2 + $0x10] sm:$0xff]  ;;  %786 = vmatprep.subr.bf16.mxu1 %v785_v22  ;;  %v253_v33 = vld [vmem:[%s926_s25 + $0x38] sm:$0xff]  ;;  %v551_v44 = vld [vmem:[%s931_s28 + $0x8] sm:$0xff] }
  0x20   : > { %v257_v12 = vld [vmem:[#allocation2 + $0x18] sm:$0xff]  ;;  %770 = vmatprep.subr.bf16.mxu0 %v769_v11  ;;  %v260_v18 = vld [vmem:[#allocation2 + $0x30] sm:$0xff]  ;;  %788 = vmatpush3.bf16.msra.mxu1 %v785_v22  ;;  %v550_v47 = vld [vmem:[%s931_s28] sm:$0xff] }
  0x21   : > { %v773_v13 = vpack.c.bf16 %v257_v12, %v256_v10  ;;  %v258_v14 = vld [vmem:[#allocation2 + $0x20] sm:$0xff]  ;;  %772 = vmatpush3.bf16.msra.mxu0 %v769_v11  ;;  %v261_v21 = vld [vmem:[#allocation2 + $0x38] sm:$0xff]  ;;  %790 = vmatprep.subr.bf16.mxu1 %v789_v25  ;;  %v252_v32 = vld [vmem:[%s926_s25 + $0x30] sm:$0xff] }
  0x22   : > { %v259_v15 = vld [vmem:[#allocation2 + $0x28] sm:$0xff]  ;;  %v781_v26 = vpack.c.bf16 %v261_v21, %v260_v18  ;;  %v553_v54 = vld [vmem:[%s931_s28 + $0x18] sm:$0xff]  ;;  %v552_v57 = vld [vmem:[%s931_s28 + $0x10] sm:$0xff] }
  0x23   : > { %774 = vmatprep.subr.bf16.mxu0 %v773_v13  ;;  %v777_v17 = vpack.c.bf16 %v259_v15, %v258_v14  ;;  %v555_v0 = vld [vmem:[%s931_s28 + $0x28] sm:$0xff]  ;;  %v554_v3 = vld [vmem:[%s931_s28 + $0x20] sm:$0xff]  ;;  %v557_v10 = vld [vmem:[%s931_s28 + $0x38] sm:$0xff] }
  0x24   : > { %792 = vmatpush3.bf16.msra.mxu1 %v789_v25 }
  0x25   : > { %776 = vmatpush3.bf16.msra.mxu0 %v773_v13  ;;  %v556_v13 = vld [vmem:[%s931_s28 + $0x30] sm:$0xff] }
  0x26   : > { %778 = vmatprep.subr.bf16.mxu0 %v777_v17 }
  0x29   : > { %780 = vmatpush3.bf16.msra.mxu0 %v777_v17 }
  0x2a   : > { %782 = vmatprep.subr.bf16.mxu0 %v781_v26 }
  0x2d   : > { %784 = vmatpush3.bf16.msra.mxu0 %v781_v26 }
  0x30   : > { %738 = vmatmul.mubr.msk.f32.vlgmr.msra.gmra.mrb[0].mxu0 %vm266_vm1, %v247_v27 }
  0x31   : > { %740 = vmatprep.mubr.msk.f32.mxu0 %vm266_vm1, %v248_v28 }
  0x34   : > { %741 = vmatmul.mubr.msk.f32.gmra.mrb[2].mxu0 %vm266_vm1, %v249_v29 }
  0x35   : > { %743 = vmatprep.mubr.msk.f32.mxu0 %vm266_vm1, %v250_v30 }
  0x38   : > { %744 = vmatmul.mubr.msk.f32.gmra.mrb[4].mxu0 %vm266_vm1, %v251_v31 }
  0x39   : > { %746 = vmatprep.mubr.msk.f32.mxu0 %vm266_vm1, %v252_v32 }
  0x3c   : > { %747 = vmatmul.mubr.msk.f32.gmra.mrb[6].mxu0 %vm266_vm1, %v253_v33 }
 0x103   : > { %v739_v34 = vpop.f32.mrb[0].mxu0 }
 0x104   : > { %v357_v35 = vpop.f32.mrb[1].mxu0 }
 0x105   : > { %757 = vmatprep.mubr.msk.f32.mxu1 %vm396_vm2, %v357_v35 }
 0x106   : > { %758 = vmatmul.mubr.msk.f32.vlgmr.msra.gmra.mrb[0].mxu1 %vm396_vm2, %v739_v34 }
 0x107   : > { %v742_v36 = vpop.f32.mrb[2].mxu0 }
 0x108   : > { %v367_v37 = vpop.f32.mrb[3].mxu0 }
 0x109   : > { %760 = vmatprep.mubr.msk.f32.mxu1 %vm396_vm2, %v367_v37 }
 0x10a   : > { %761 = vmatmul.mubr.msk.f32.gmra.mrb[2].mxu1 %vm396_vm2, %v742_v36 }
 0x10b   : > { %v745_v38 = vpop.f32.mrb[4].mxu0 }
 0x10c   : > { %v377_v39 = vpop.f32.mrb[5].mxu0 }
 0x10d   : > { %763 = vmatprep.mubr.msk.f32.mxu1 %vm396_vm2, %v377_v39 }
 0x10e   : > { %764 = vmatmul.mubr.msk.f32.gmra.mrb[4].mxu1 %vm396_vm2, %v745_v38 }
 0x10f   : > { %v748_v40 = vpop.f32.mrb[6].mxu0 }
 0x110   : > { %v387_v41 = vpop.f32.mrb[7].mxu0 }
 0x111   : > { %766 = vmatprep.mubr.msk.f32.mxu1 %vm396_vm2, %v387_v41 }
 0x112   : > { %767 = vmatmul.mubr.msk.f32.gmra.mrb[6].mxu1 %vm396_vm2, %v748_v40 }
 0x1d9   : > { %v759_v42 = vpop.f32.mrb[0].mxu1 }
 0x1da   : > { %vm527_vm3 = vcmp.gt.f32.partialorder %v759_v42, 0.0  ;;  %v535_v43 = vmul.f32 0.01, %v759_v42  ;;  %v487_v45 = vpop.f32.mrb[1].mxu1 }
 0x1db   : > { %vm526_vm4 = vcmp.gt.f32.partialorder %v487_v45, 0.0  ;;  %v534_v46 = vmul.f32 0.01, %v487_v45 }
 0x1dc   : > { %v543_v48 = vsel %vm527_vm3, %v759_v42, %v535_v43 }
 0x1dd   : > { %v559_v49 = vadd.f32 %v551_v44, %v543_v48  ;;  %575 = vst.msk [vmem:[#allocation2 + $0x8] sm:$0xff] %vm396_vm2, %v543_v48  ;;  %v542_v50 = vsel %vm526_vm4, %v487_v45, %v534_v46  ;;  %v762_v51 = vpop.f32.mrb[2].mxu1 }
 0x1de   : > { %v558_v52 = vadd.f32 %v550_v47, %v542_v50  ;;  %574 = vst.msk [vmem:[#allocation2] sm:$0xff] %vm396_vm2, %v542_v50  ;;  %vm529_vm5 = vcmp.gt.f32.partialorder %v762_v51, 0.0  ;;  %v537_v53 = vmul.f32 0.01, %v762_v51  ;;  %v497_v55 = vpop.f32.mrb[3].mxu1 }
 0x1df   : > { %567 = vst.msk [vmem:[%s931_s28 + $0x8] sm:$0xff] %vm396_vm2, %v559_v49  ;;  %vm528_vm6 = vcmp.gt.f32.partialorder %v497_v55, 0.0  ;;  %v536_v56 = vmul.f32 0.01, %v497_v55 }
 0x1e0   : > { %566 = vst.msk [vmem:[%s931_s28] sm:$0xff] %vm396_vm2, %v558_v52  ;;  %v545_v58 = vsel %vm529_vm5, %v762_v51, %v537_v53 }
 0x1e1   : > { %v561_v59 = vadd.f32 %v553_v54, %v545_v58  ;;  %577 = vst.msk [vmem:[#allocation2 + $0x18] sm:$0xff] %vm396_vm2, %v545_v58  ;;  %v544_v60 = vsel %vm528_vm6, %v497_v55, %v536_v56  ;;  %v765_v61 = vpop.f32.mrb[4].mxu1 }
 0x1e2   : > { %v560_v62 = vadd.f32 %v552_v57, %v544_v60  ;;  %576 = vst.msk [vmem:[#allocation2 + $0x10] sm:$0xff] %vm396_vm2, %v544_v60  ;;  %vm531_vm7 = vcmp.gt.f32.partialorder %v765_v61, 0.0  ;;  %v539_v63 = vmul.f32 0.01, %v765_v61  ;;  %v507_v1 = vpop.f32.mrb[5].mxu1 }
 0x1e3   : > { %569 = vst.msk [vmem:[%s931_s28 + $0x18] sm:$0xff] %vm396_vm2, %v561_v59  ;;  %vm530_vm8 = vcmp.gt.f32.partialorder %v507_v1, 0.0  ;;  %v538_v2 = vmul.f32 0.01, %v507_v1 }
 0x1e4   : > { %568 = vst.msk [vmem:[%s931_s28 + $0x10] sm:$0xff] %vm396_vm2, %v560_v62  ;;  %v547_v4 = vsel %vm531_vm7, %v765_v61, %v539_v63 }
 0x1e5   : > { %v563_v5 = vadd.f32 %v555_v0, %v547_v4  ;;  %579 = vst.msk [vmem:[#allocation2 + $0x28] sm:$0xff] %vm396_vm2, %v547_v4  ;;  %v546_v6 = vsel %vm530_vm8, %v507_v1, %v538_v2  ;;  %v768_v7 = vpop.f32.mrb[6].mxu1 }
 0x1e6   : > { %v562_v8 = vadd.f32 %v554_v3, %v546_v6  ;;  %578 = vst.msk [vmem:[#allocation2 + $0x20] sm:$0xff] %vm396_vm2, %v546_v6  ;;  %vm533_vm9 = vcmp.gt.f32.partialorder %v768_v7, 0.0  ;;  %v541_v9 = vmul.f32 0.01, %v768_v7  ;;  %v517_v11 = vpop.f32.mrb[7].mxu1 }
 0x1e7   : > { %571 = vst.msk [vmem:[%s931_s28 + $0x28] sm:$0xff] %vm396_vm2, %v563_v5  ;;  %vm532_vm10 = vcmp.gt.f32.partialorder %v517_v11, 0.0  ;;  %v540_v12 = vmul.f32 0.01, %v517_v11 }
 0x1e8   : > { %570 = vst.msk [vmem:[%s931_s28 + $0x20] sm:$0xff] %vm396_vm2, %v562_v8  ;;  %v549_v14 = vsel %vm533_vm9, %v768_v7, %v541_v9 }
 0x1e9   : > { %v565_v15 = vadd.f32 %v557_v10, %v549_v14  ;;  %581 = vst.msk [vmem:[#allocation2 + $0x38] sm:$0xff] %vm396_vm2, %v549_v14  ;;  %v548_v16 = vsel %vm532_vm10, %v517_v11, %v540_v12 }
 0x1ea   : > { %v564_v17 = vadd.f32 %v556_v13, %v548_v16  ;;  %580 = vst.msk [vmem:[#allocation2 + $0x30] sm:$0xff] %vm396_vm2, %v548_v16 }
 0x1eb   : > { %573 = vst.msk [vmem:[%s931_s28 + $0x38] sm:$0xff] %vm396_vm2, %v565_v15 }
 0x1ec   : > { %572 = vst.msk [vmem:[%s931_s28 + $0x30] sm:$0xff] %vm396_vm2, %v564_v17 }
 0x1ed PF: > { %s13_s16 = sadd.s32 1, %s871_s16   ;;  %s1065_s12 = smov %s863_s14 }
 0x1ee   : > { %p10_p8 = scmp.ge.s32.totalorder %s13_s16, 8   ;;  %s1066_s13 = smov %s867_s15 }
 0x1ef   : > { %s1067_s14 = smov %s1070_s17  ;;  %s1068_s15 = smov %s1074_s18 }
 0x1f0   :  { %12 = sbr.rel (!%p10_p8) target bundleno = 3 (0x3), region = 69 }

</bundles_post_ra>
